<compile_context>
chip_gen: v7x
topology: tpu7x:2x2x1
jax: 0.10.0
libtpu: 0.0.40
codegen_flags: <defaults>
</compile_context>

<pallas_src>
import functools
import math

import jax
import jax.numpy as jnp
import numpy as np
from jax.experimental import pallas as pl
from jax.experimental.pallas import tpu as pltpu

K = 3                       # conv kernel size
PAD = K // 2                # conv padding = 1
NUM_LAYERS = 3              # 2 hidden convs + cls conv
HALO = NUM_LAYERS * PAD     # receptive-field halo of the stacked convs = 3
_LANE = 128
_MiB = 1024 * 1024


def _conv_k3_valid(x_ct, w_ref, b_ref):
    """'valid' k=3 conv as three accumulating MXU dots on overlapping slices.

    x_ct : (Cin, W) layer input (compute dtype).
    w_ref: (K, Cout, Cin) ref, tap-major.
    b_ref: (Cout, 1) f32 ref (broadcasts over lanes).
    Returns f32 (Cout, W-2); output column j is centered on input column j+1.
    """
    w_out = x_ct.shape[1] - (K - 1)
    y = jnp.dot(w_ref[0], x_ct[:, 0:w_out], preferred_element_type=jnp.float32)
    y = y + jnp.dot(w_ref[1], x_ct[:, 1:w_out + 1], preferred_element_type=jnp.float32)
    y = y + jnp.dot(w_ref[2], x_ct[:, 2:w_out + 2], preferred_element_type=jnp.float32)
    return y + b_ref[...].astype(jnp.float32)


def _hidden(x_ct, w_ref, b_ref, first_pos, t_len, cdt):
    """conv + Identity norm + ReLU, with true-sequence-boundary zeroing.

    The PyTorch module zero-pads every conv's input by 1, so hidden activations at
    global positions outside [0, t_len) must be exactly zero before the next conv.
    `first_pos` is the global time position of output column 0.
    """
    y = _conv_k3_valid(x_ct, w_ref, b_ref)                        # (Cout, W-2) f32
    pos = jax.lax.broadcasted_iota(jnp.int32, y.shape, 1) + first_pos
    valid = (pos >= 0) & (pos < t_len)
    y = jnp.where(valid, jnp.maximum(y, 0.0), 0.0)                # ReLU + boundary mask (f32)
    return y.astype(cdt)


def _cls_head_kernel(x_ref, w1_ref, b1_ref, w2_ref, b2_ref, w3_ref, b3_ref, o_ref,
                     *, tt, t_len, single_tile):
    # x_ref: (C, nT*tt + 2*HALO) padded full sequence of one batch element (VMEM-resident
    #        across the inner T-tile axis).  o_ref: (NC, tt) output tile (partial at edge).
    if single_tile:
        start = 0
        xw = x_ref[...]                                           # (C, tt + 2*HALO)
    else:
        start = pl.multiple_of(pl.program_id(1) * tt, _LANE)
        xw = x_ref[:, pl.ds(start, tt + 2 * HALO)]                # halo'd window

    cdt = xw.dtype
    h = _hidden(xw, w1_ref, b1_ref, start - 2, t_len, cdt)        # (F, tt+4)
    h = _hidden(h, w2_ref, b2_ref, start - 1, t_len, cdt)         # (F, tt+2)
    logits = _conv_k3_valid(h, w3_ref, b3_ref)                    # (NC, tt) f32
    o_ref[...] = logits.astype(o_ref.dtype)


def pt_transformer_cls_head(x_bct, w1, b1, w2, b2, w3, b3, *,
                            t_tile=1024, compute_dtype=jnp.bfloat16,
                            vmem_limit_bytes=None):
    """ActionFormer classification head forward (with_ln=False path).

    x_bct: (B, C, T).  Conv weights in PyTorch layout (Cout, Cin, K); biases (Cout,).
    compute_dtype: MXU operand dtype (bf16 default); accumulation is f32, logits are f32.
    """
    B, C, T = x_bct.shape
    F = w1.shape[0]
    NC = w3.shape[0]
    assert w1.shape == (F, C, K) and w2.shape == (F, F, K) and w3.shape == (NC, F, K)

    cdt = jnp.dtype(compute_dtype)

    # (Cout, Cin, K) -> (K, Cout, Cin): tap-major so the kernel does w_ref[k] @ slice_k.
    w1s = jnp.transpose(w1, (2, 0, 1)).astype(cdt)
    w2s = jnp.transpose(w2, (2, 0, 1)).astype(cdt)
    w3s = jnp.transpose(w3, (2, 0, 1)).astype(cdt)
    b1c = b1.reshape(F, 1).astype(jnp.float32)
    b2c = b2.reshape(F, 1).astype(jnp.float32)
    b3c = b3.reshape(NC, 1).astype(jnp.float32)

    # T tiling: lane-aligned tiles when T is large, else a single full tile. Tiles are
    # sized to balance the grid (minimises overcompute in the last, partial tile).
    if T > max(t_tile, _LANE):
        nt0 = pl.cdiv(T, max(_LANE, (t_tile // _LANE) * _LANE))
        tt = ((pl.cdiv(T, nt0) + _LANE - 1) // _LANE) * _LANE
        nt = pl.cdiv(T, tt)
    else:
        tt, nt = T, 1
    t_pad = nt * tt
    w_full = t_pad + 2 * HALO

    # Zero-pad the time axis by the conv halo (+ right-pad to a whole number of tiles).
    # TODO(synk): fold this pad (and the bf16 cast) into the kernel via per-tile halo DMA
    # with in-kernel input-boundary masking so x is not rewritten through HBM here.
    xp = jnp.pad(x_bct.astype(cdt), ((0, 0), (0, 0), (HALO, (t_pad - T) + HALO)))

    # Explicit VMEM budget (double-buffered blocks + weights + conv temporaries),
    # clamped to the v7x 64 MiB physical ceiling.
    if vmem_limit_bytes is None:
        isz = cdt.itemsize
        est = (2 * (C * w_full * isz                                  # resident x block
                    + (K * F * C + K * F * F + K * NC * F) * isz      # weights
                    + (2 * F + NC) * 4                                 # biases
                    + NC * tt * 4)                                     # output block
               + (3 * C + 7 * F + 2 * NC) * (tt + 2 * HALO) * 4)       # conv temporaries
        vmem_limit_bytes = int(min(max(32 * _MiB, 3 * est // 2), 64 * _MiB))

    # Megacore: shard over batch when B > 1 (x is full-T resident, so sharding T would
    # re-read the whole sequence on both cores); shard over T tiles only when B == 1.
    dims = ("parallel", "arbitrary") if B > 1 else ("arbitrary", "parallel")

    cost = pl.CostEstimate(
        flops=2 * B * t_pad * K * (C * F + F * F + F * NC),
        transcendentals=0,
        bytes_accessed=int(x_bct.size * cdt.itemsize
                           + (w1s.size + w2s.size + w3s.size) * cdt.itemsize
                           + (b1c.size + b2c.size + b3c.size) * 4
                           + B * NC * T * 4))

    kernel = functools.partial(_cls_head_kernel, tt=tt, t_len=T, single_tile=(nt == 1))

    return pl.pallas_call(
        kernel,
        out_shape=jax.ShapeDtypeStruct((B, NC, T), jnp.float32),
        grid=(B, nt),
        in_specs=[
            # x: full padded sequence of one batch element; block index ignores the
            # T-tile axis so it stays VMEM-resident (no re-DMA) across the inner tiles.
            pl.BlockSpec((None, C, w_full), lambda b, t: (b, 0, 0)),
            pl.BlockSpec((K, F, C), lambda b, t: (0, 0, 0)),    # w1 taps (resident)
            pl.BlockSpec((F, 1), lambda b, t: (0, 0)),          # b1
            pl.BlockSpec((K, F, F), lambda b, t: (0, 0, 0)),    # w2
            pl.BlockSpec((F, 1), lambda b, t: (0, 0)),          # b2
            pl.BlockSpec((K, NC, F), lambda b, t: (0, 0, 0)),   # w3 (cls head)
            pl.BlockSpec((NC, 1), lambda b, t: (0, 0)),         # b3
        ],
        # Output written directly at (B, NC, T): the last tile is a partial edge block,
        # so there is no wrapper-side trim pass.
        out_specs=pl.BlockSpec((None, NC, tt), lambda b, t: (b, 0, t)),
        compiler_params=pltpu.CompilerParams(
            dimension_semantics=dims, vmem_limit_bytes=vmem_limit_bytes),
        cost_estimate=cost,
    )(xp, w1s, b1c, w2s, b2c, w3s, b3c)


def _ref_forward(x_bct, w1, b1, w2, b2, w3, b3):
    """Pure-JAX reference mirroring the PyTorch module (NCT conv1d, padding=1)."""
    def conv(x, w_oik, b_o):
        y = jax.lax.conv_general_dilated(
            x, w_oik, window_strides=(1,), padding=((PAD, PAD),),
            dimension_numbers=("NCH", "OIH", "NCH"))
        return y + b_o[None, :, None]

    h = jax.nn.relu(conv(x_bct, w1, b1))
    h = jax.nn.relu(conv(h, w2, b2))
    return conv(h, w3, b3)


if __name__ == "__main__":
    # Small shapes consistent with the module: input_dim=32, feat_dim=32,
    # num_classes=8, batch=2, sequence length T=16.
    B, input_dim, feat_dim, num_classes, T = 2, 32, 32, 8, 16
    prior_prob = 0.01

    key = jax.random.PRNGKey(0)
    k1, k2, k3, k4, k5, kx = jax.random.split(key, 6)

    # PyTorch-layout conv weights (Cout, Cin, K); biases (Cout,).
    w1 = jax.random.normal(k1, (feat_dim, input_dim, K), jnp.float32) * 0.05
    b1 = jax.random.normal(k2, (feat_dim,), jnp.float32) * 0.05
    w2 = jax.random.normal(k3, (feat_dim, feat_dim, K), jnp.float32) * 0.05
    b2 = jax.random.normal(k4, (feat_dim,), jnp.float32) * 0.05
    w3 = jax.random.normal(k5, (num_classes, feat_dim, K), jnp.float32) * 0.05
    # cls_head bias initialised to the focal-loss prior, as in __init__ (empty_cls=[]).
    bias_value = -math.log((1.0 - prior_prob) / prior_prob)
    b3 = jnp.full((num_classes,), bias_value, jnp.float32)

    x = jax.random.normal(kx, (B, input_dim, T), jnp.float32)   # (B, C, T) like PyTorch

    ref = jax.block_until_ready(_ref_forward(x, w1, b1, w2, b2, w3, b3))

    # f32 operands: tight check of the kernel math (incl. per-layer boundary padding).
    out_f32 = jax.block_until_ready(
        pt_transformer_cls_head(x, w1, b1, w2, b2, w3, b3, compute_dtype=jnp.float32))
    np.testing.assert_allclose(np.asarray(out_f32), np.asarray(ref), rtol=1e-4, atol=1e-4)

    # Default production path (bf16 MXU operands, f32 accumulation): looser tolerance.
    out_bf16 = jax.block_until_ready(
        pt_transformer_cls_head(x, w1, b1, w2, b2, w3, b3))
    np.testing.assert_allclose(np.asarray(out_bf16), np.asarray(ref), rtol=2e-2, atol=2e-2)

    assert out_bf16.shape == (B, num_classes, T)
    print("KERNEL_OK")
</pallas_src>

<mosaic_0001>
module attributes {stable_mosaic.version = 11 : i64} {
  func.func @_cls_head_kernel(%arg0: i32, %arg1: i32, %arg2: memref<1x32x22xf32, #tpu.memory_space<vmem>>, %arg3: memref<3x32x32xf32, #tpu.memory_space<vmem>>, %arg4: memref<32x1xf32, #tpu.memory_space<vmem>>, %arg5: memref<3x32x32xf32, #tpu.memory_space<vmem>>, %arg6: memref<32x1xf32, #tpu.memory_space<vmem>>, %arg7: memref<3x8x32xf32, #tpu.memory_space<vmem>>, %arg8: memref<8x1xf32, #tpu.memory_space<vmem>>, %arg9: memref<1x8x16xf32, #tpu.memory_space<vmem>>) attributes {dimension_semantics = [#tpu.dimension_semantics<parallel>, #tpu.dimension_semantics<arbitrary>], iteration_bounds = array<i64: 2, 1>, scalar_prefetch = 0 : i64, scratch_operands = 0 : i64, tpu.core_type = #tpu.core_type<tc>, window_params = [{transform_indices = @transform_0, window_bounds = array<i64: 1, 32, 22>}, {pipeline_mode = #tpu.pipeline_mode<synchronous>, transform_indices = @transform_1, window_bounds = array<i64: 3, 32, 32>}, {pipeline_mode = #tpu.pipeline_mode<synchronous>, transform_indices = @transform_2, window_bounds = array<i64: 32, 1>}, {pipeline_mode = #tpu.pipeline_mode<synchronous>, transform_indices = @transform_3, window_bounds = array<i64: 3, 32, 32>}, {pipeline_mode = #tpu.pipeline_mode<synchronous>, transform_indices = @transform_4, window_bounds = array<i64: 32, 1>}, {pipeline_mode = #tpu.pipeline_mode<synchronous>, transform_indices = @transform_5, window_bounds = array<i64: 3, 8, 32>}, {pipeline_mode = #tpu.pipeline_mode<synchronous>, transform_indices = @transform_6, window_bounds = array<i64: 8, 1>}, {transform_indices = @transform_7, window_bounds = array<i64: 1, 8, 16>}]} {
    %c0 = arith.constant 0 : index
    %c0_0 = arith.constant 0 : index
    %c0_1 = arith.constant 0 : index
    %0 = vector.load %arg2[%c0, %c0_0, %c0_1] : memref<1x32x22xf32, #tpu.memory_space<vmem>>, vector<1x32x22xf32>
    %1 = vector.shape_cast %0 : vector<1x32x22xf32> to vector<32x22xf32>
    %c0_2 = arith.constant 0 : index
    %c0_3 = arith.constant 0 : index
    %c0_4 = arith.constant 0 : index
    %2 = vector.load %arg3[%c0_2, %c0_3, %c0_4] : memref<3x32x32xf32, #tpu.memory_space<vmem>>, vector<1x32x32xf32>
    %3 = vector.shape_cast %2 : vector<1x32x32xf32> to vector<32x32xf32>
    %4 = vector.extract_strided_slice %1 {offsets = [0, 0], sizes = [32, 20], strides = [1, 1]} : vector<32x22xf32> to vector<32x20xf32>
    %cst = arith.constant dense<0.000000e+00> : vector<32x20xf32>
    %5 = tpu.matmul %3, %4, %cst {dimension_numbers = #tpu.dot_dimension_numbers<[1], [0], [0], [1], [0, 0, 1, 1], [], []>} : vector<32x32xf32>, vector<32x20xf32>, vector<32x20xf32> -> vector<32x20xf32>
    %c1 = arith.constant 1 : index
    %c0_5 = arith.constant 0 : index
    %c0_6 = arith.constant 0 : index
    %6 = vector.load %arg3[%c1, %c0_5, %c0_6] : memref<3x32x32xf32, #tpu.memory_space<vmem>>, vector<1x32x32xf32>
    %7 = vector.shape_cast %6 : vector<1x32x32xf32> to vector<32x32xf32>
    %8 = vector.extract_strided_slice %1 {offsets = [0, 1], sizes = [32, 20], strides = [1, 1]} : vector<32x22xf32> to vector<32x20xf32>
    %cst_7 = arith.constant dense<0.000000e+00> : vector<32x20xf32>
    %9 = tpu.matmul %7, %8, %cst_7 {dimension_numbers = #tpu.dot_dimension_numbers<[1], [0], [0], [1], [0, 0, 1, 1], [], []>} : vector<32x32xf32>, vector<32x20xf32>, vector<32x20xf32> -> vector<32x20xf32>
    %10 = arith.addf %5, %9 : vector<32x20xf32>
    %c2 = arith.constant 2 : index
    %c0_8 = arith.constant 0 : index
    %c0_9 = arith.constant 0 : index
    %11 = vector.load %arg3[%c2, %c0_8, %c0_9] : memref<3x32x32xf32, #tpu.memory_space<vmem>>, vector<1x32x32xf32>
    %12 = vector.shape_cast %11 : vector<1x32x32xf32> to vector<32x32xf32>
    %13 = vector.extract_strided_slice %1 {offsets = [0, 2], sizes = [32, 20], strides = [1, 1]} : vector<32x22xf32> to vector<32x20xf32>
    %cst_10 = arith.constant dense<0.000000e+00> : vector<32x20xf32>
    %14 = tpu.matmul %12, %13, %cst_10 {dimension_numbers = #tpu.dot_dimension_numbers<[1], [0], [0], [1], [0, 0, 1, 1], [], []>} : vector<32x32xf32>, vector<32x20xf32>, vector<32x20xf32> -> vector<32x20xf32>
    %15 = arith.addf %10, %14 : vector<32x20xf32>
    %c0_11 = arith.constant 0 : index
    %c0_12 = arith.constant 0 : index
    %16 = vector.load %arg4[%c0_11, %c0_12] : memref<32x1xf32, #tpu.memory_space<vmem>>, vector<32x1xf32>
    %17 = vector.broadcast %16 : vector<32x1xf32> to vector<32x20xf32>
    %18 = arith.addf %15, %17 : vector<32x20xf32>
    %19 = tpu.iota {dimensions = array<i32: 1>} : vector<32x20xi32>
    %c-2_i32 = arith.constant -2 : i32
    %20 = vector.broadcast %c-2_i32 : i32 to vector<32x20xi32>
    %21 = arith.addi %19, %20 : vector<32x20xi32>
    %c0_i32 = arith.constant 0 : i32
    %22 = vector.broadcast %c0_i32 : i32 to vector<32x20xi32>
    %23 = arith.cmpi sge, %21, %22 : vector<32x20xi32>
    %c16_i32 = arith.constant 16 : i32
    %24 = vector.broadcast %c16_i32 : i32 to vector<32x20xi32>
    %25 = arith.cmpi slt, %21, %24 : vector<32x20xi32>
    %26 = arith.andi %23, %25 : vector<32x20xi1>
    %cst_13 = arith.constant 0.000000e+00 : f32
    %27 = vector.broadcast %cst_13 : f32 to vector<32x20xf32>
    %28 = arith.maximumf %18, %27 : vector<32x20xf32>
    %cst_14 = arith.constant 0.000000e+00 : f32
    %29 = vector.broadcast %cst_14 : f32 to vector<32x20xf32>
    %30 = arith.select %26, %28, %29 : vector<32x20xi1>, vector<32x20xf32>
    %c0_15 = arith.constant 0 : index
    %c0_16 = arith.constant 0 : index
    %c0_17 = arith.constant 0 : index
    %31 = vector.load %arg5[%c0_15, %c0_16, %c0_17] : memref<3x32x32xf32, #tpu.memory_space<vmem>>, vector<1x32x32xf32>
    %32 = vector.shape_cast %31 : vector<1x32x32xf32> to vector<32x32xf32>
    %33 = vector.extract_strided_slice %30 {offsets = [0, 0], sizes = [32, 18], strides = [1, 1]} : vector<32x20xf32> to vector<32x18xf32>
    %cst_18 = arith.constant dense<0.000000e+00> : vector<32x18xf32>
    %34 = tpu.matmul %32, %33, %cst_18 {dimension_numbers = #tpu.dot_dimension_numbers<[1], [0], [0], [1], [0, 0, 1, 1], [], []>} : vector<32x32xf32>, vector<32x18xf32>, vector<32x18xf32> -> vector<32x18xf32>
    %c1_19 = arith.constant 1 : index
    %c0_20 = arith.constant 0 : index
    %c0_21 = arith.constant 0 : index
    %35 = vector.load %arg5[%c1_19, %c0_20, %c0_21] : memref<3x32x32xf32, #tpu.memory_space<vmem>>, vector<1x32x32xf32>
    %36 = vector.shape_cast %35 : vector<1x32x32xf32> to vector<32x32xf32>
    %37 = vector.extract_strided_slice %30 {offsets = [0, 1], sizes = [32, 18], strides = [1, 1]} : vector<32x20xf32> to vector<32x18xf32>
    %cst_22 = arith.constant dense<0.000000e+00> : vector<32x18xf32>
    %38 = tpu.matmul %36, %37, %cst_22 {dimension_numbers = #tpu.dot_dimension_numbers<[1], [0], [0], [1], [0, 0, 1, 1], [], []>} : vector<32x32xf32>, vector<32x18xf32>, vector<32x18xf32> -> vector<32x18xf32>
    %39 = arith.addf %34, %38 : vector<32x18xf32>
    %c2_23 = arith.constant 2 : index
    %c0_24 = arith.constant 0 : index
    %c0_25 = arith.constant 0 : index
    %40 = vector.load %arg5[%c2_23, %c0_24, %c0_25] : memref<3x32x32xf32, #tpu.memory_space<vmem>>, vector<1x32x32xf32>
    %41 = vector.shape_cast %40 : vector<1x32x32xf32> to vector<32x32xf32>
    %42 = vector.extract_strided_slice %30 {offsets = [0, 2], sizes = [32, 18], strides = [1, 1]} : vector<32x20xf32> to vector<32x18xf32>
    %cst_26 = arith.constant dense<0.000000e+00> : vector<32x18xf32>
    %43 = tpu.matmul %41, %42, %cst_26 {dimension_numbers = #tpu.dot_dimension_numbers<[1], [0], [0], [1], [0, 0, 1, 1], [], []>} : vector<32x32xf32>, vector<32x18xf32>, vector<32x18xf32> -> vector<32x18xf32>
    %44 = arith.addf %39, %43 : vector<32x18xf32>
    %c0_27 = arith.constant 0 : index
    %c0_28 = arith.constant 0 : index
    %45 = vector.load %arg6[%c0_27, %c0_28] : memref<32x1xf32, #tpu.memory_space<vmem>>, vector<32x1xf32>
    %46 = vector.broadcast %45 : vector<32x1xf32> to vector<32x18xf32>
    %47 = arith.addf %44, %46 : vector<32x18xf32>
    %48 = tpu.iota {dimensions = array<i32: 1>} : vector<32x18xi32>
    %c-1_i32 = arith.constant -1 : i32
    %49 = vector.broadcast %c-1_i32 : i32 to vector<32x18xi32>
    %50 = arith.addi %48, %49 : vector<32x18xi32>
    %c0_i32_29 = arith.constant 0 : i32
    %51 = vector.broadcast %c0_i32_29 : i32 to vector<32x18xi32>
    %52 = arith.cmpi sge, %50, %51 : vector<32x18xi32>
    %c16_i32_30 = arith.constant 16 : i32
    %53 = vector.broadcast %c16_i32_30 : i32 to vector<32x18xi32>
    %54 = arith.cmpi slt, %50, %53 : vector<32x18xi32>
    %55 = arith.andi %52, %54 : vector<32x18xi1>
    %cst_31 = arith.constant 0.000000e+00 : f32
    %56 = vector.broadcast %cst_31 : f32 to vector<32x18xf32>
    %57 = arith.maximumf %47, %56 : vector<32x18xf32>
    %cst_32 = arith.constant 0.000000e+00 : f32
    %58 = vector.broadcast %cst_32 : f32 to vector<32x18xf32>
    %59 = arith.select %55, %57, %58 : vector<32x18xi1>, vector<32x18xf32>
    %c0_33 = arith.constant 0 : index
    %c0_34 = arith.constant 0 : index
    %c0_35 = arith.constant 0 : index
    %60 = vector.load %arg7[%c0_33, %c0_34, %c0_35] : memref<3x8x32xf32, #tpu.memory_space<vmem>>, vector<1x8x32xf32>
    %61 = vector.shape_cast %60 : vector<1x8x32xf32> to vector<8x32xf32>
    %62 = vector.extract_strided_slice %59 {offsets = [0, 0], sizes = [32, 16], strides = [1, 1]} : vector<32x18xf32> to vector<32x16xf32>
    %cst_36 = arith.constant dense<0.000000e+00> : vector<8x16xf32>
    %63 = tpu.matmul %61, %62, %cst_36 {dimension_numbers = #tpu.dot_dimension_numbers<[1], [0], [0], [1], [0, 0, 1, 1], [], []>} : vector<8x32xf32>, vector<32x16xf32>, vector<8x16xf32> -> vector<8x16xf32>
    %c1_37 = arith.constant 1 : index
    %c0_38 = arith.constant 0 : index
    %c0_39 = arith.constant 0 : index
    %64 = vector.load %arg7[%c1_37, %c0_38, %c0_39] : memref<3x8x32xf32, #tpu.memory_space<vmem>>, vector<1x8x32xf32>
    %65 = vector.shape_cast %64 : vector<1x8x32xf32> to vector<8x32xf32>
    %66 = vector.extract_strided_slice %59 {offsets = [0, 1], sizes = [32, 16], strides = [1, 1]} : vector<32x18xf32> to vector<32x16xf32>
    %cst_40 = arith.constant dense<0.000000e+00> : vector<8x16xf32>
    %67 = tpu.matmul %65, %66, %cst_40 {dimension_numbers = #tpu.dot_dimension_numbers<[1], [0], [0], [1], [0, 0, 1, 1], [], []>} : vector<8x32xf32>, vector<32x16xf32>, vector<8x16xf32> -> vector<8x16xf32>
    %68 = arith.addf %63, %67 : vector<8x16xf32>
    %c2_41 = arith.constant 2 : index
    %c0_42 = arith.constant 0 : index
    %c0_43 = arith.constant 0 : index
    %69 = vector.load %arg7[%c2_41, %c0_42, %c0_43] : memref<3x8x32xf32, #tpu.memory_space<vmem>>, vector<1x8x32xf32>
    %70 = vector.shape_cast %69 : vector<1x8x32xf32> to vector<8x32xf32>
    %71 = vector.extract_strided_slice %59 {offsets = [0, 2], sizes = [32, 16], strides = [1, 1]} : vector<32x18xf32> to vector<32x16xf32>
    %cst_44 = arith.constant dense<0.000000e+00> : vector<8x16xf32>
    %72 = tpu.matmul %70, %71, %cst_44 {dimension_numbers = #tpu.dot_dimension_numbers<[1], [0], [0], [1], [0, 0, 1, 1], [], []>} : vector<8x32xf32>, vector<32x16xf32>, vector<8x16xf32> -> vector<8x16xf32>
    %73 = arith.addf %68, %72 : vector<8x16xf32>
    %c0_45 = arith.constant 0 : index
    %c0_46 = arith.constant 0 : index
    %74 = vector.load %arg8[%c0_45, %c0_46] : memref<8x1xf32, #tpu.memory_space<vmem>>, vector<8x1xf32>
    %75 = vector.broadcast %74 : vector<8x1xf32> to vector<8x16xf32>
    %76 = arith.addf %73, %75 : vector<8x16xf32>
    %c0_47 = arith.constant 0 : index
    %c0_48 = arith.constant 0 : index
    %c0_49 = arith.constant 0 : index
    %77 = vector.load %arg9[%c0_47, %c0_48, %c0_49] : memref<1x8x16xf32, #tpu.memory_space<vmem>>, vector<1x8x16xf32>
    %78 = vector.shape_cast %77 : vector<1x8x16xf32> to vector<8x16xf32>
    %79 = vector.shape_cast %76 : vector<8x16xf32> to vector<1x8x16xf32>
    tpu.vector_store %arg9[%c0_47, %c0_48, %c0_49], %79 {strides = array<i32>} : memref<1x8x16xf32, #tpu.memory_space<vmem>>, vector<1x8x16xf32>,
    return
  }
  func.func @transform_0(%arg0: i32, %arg1: i32) -> (i32, i32, i32) {
    %c0_i32 = arith.constant 0 : i32
    %c0_i32_0 = arith.constant 0 : i32
    %c0_i32_1 = arith.constant 0 : i32
    return %arg0, %c0_i32, %c0_i32_0 : i32, i32, i32
  }
  func.func @transform_1(%arg0: i32, %arg1: i32) -> (i32, i32, i32) {
    %c0_i32 = arith.constant 0 : i32
    %c0_i32_0 = arith.constant 0 : i32
    %c0_i32_1 = arith.constant 0 : i32
    %c0_i32_2 = arith.constant 0 : i32
    return %c0_i32, %c0_i32_0, %c0_i32_1 : i32, i32, i32
  }
  func.func @transform_2(%arg0: i32, %arg1: i32) -> (i32, i32) {
    %c0_i32 = arith.constant 0 : i32
    %c0_i32_0 = arith.constant 0 : i32
    %c0_i32_1 = arith.constant 0 : i32
    return %c0_i32, %c0_i32_0 : i32, i32
  }
  func.func @transform_3(%arg0: i32, %arg1: i32) -> (i32, i32, i32) {
    %c0_i32 = arith.constant 0 : i32
    %c0_i32_0 = arith.constant 0 : i32
    %c0_i32_1 = arith.constant 0 : i32
    %c0_i32_2 = arith.constant 0 : i32
    return %c0_i32, %c0_i32_0, %c0_i32_1 : i32, i32, i32
  }
  func.func @transform_4(%arg0: i32, %arg1: i32) -> (i32, i32) {
    %c0_i32 = arith.constant 0 : i32
    %c0_i32_0 = arith.constant 0 : i32
    %c0_i32_1 = arith.constant 0 : i32
    return %c0_i32, %c0_i32_0 : i32, i32
  }
  func.func @transform_5(%arg0: i32, %arg1: i32) -> (i32, i32, i32) {
    %c0_i32 = arith.constant 0 : i32
    %c0_i32_0 = arith.constant 0 : i32
    %c0_i32_1 = arith.constant 0 : i32
    %c0_i32_2 = arith.constant 0 : i32
    return %c0_i32, %c0_i32_0, %c0_i32_1 : i32, i32, i32
  }
  func.func @transform_6(%arg0: i32, %arg1: i32) -> (i32, i32) {
    %c0_i32 = arith.constant 0 : i32
    %c0_i32_0 = arith.constant 0 : i32
    %c0_i32_1 = arith.constant 0 : i32
    return %c0_i32, %c0_i32_0 : i32, i32
  }
  func.func @transform_7(%arg0: i32, %arg1: i32) -> (i32, i32, i32) {
    %c0_i32 = arith.constant 0 : i32
    %c0_i32_0 = arith.constant 0 : i32
    return %arg0, %c0_i32, %arg1 : i32, i32, i32
  }
}

</mosaic_0001>

<bundles_post_ra>
// kernel: tpu_custom_call.1
= control target key start
LH: loop header
LB: loop body
LE: loop exit
PB: predicated region body
PF: predicated region fallthrough
CT: control target
= control target key end

     0   :  { %12 = vsyncpa [#allocation3], 0  ;;  %s2409_s0 = inlined_call_operand.vmem [shape: f32[2,32,22], index: 0, kind: input, shape index: {}]   ;;  %s2410_s1 = inlined_call_operand.vmem [shape: f32[3,32,32], index: 1, kind: input, shape index: {}]   ;;  %s2411_s2 = inlined_call_operand.vmem [shape: f32[32,1], index: 2, kind: input, shape index: {}]   ;;  %s2412_s3 = inlined_call_operand.vmem [shape: f32[3,32,32], index: 3, kind: input, shape index: {}]   ;;  %s2413_s4 = inlined_call_operand.vmem [shape: f32[32,1], index: 4, kind: input, shape index: {}]   ;;  %s2414_s5 = inlined_call_operand.hbm [shape: f32[3,8,32], index: 5, kind: input, shape index: {}]   ;;  %s2415_s6 = inlined_call_operand.vmem [shape: f32[8,1], index: 6, kind: input, shape index: {}]   ;;  %s2416_s7 = inlined_call_operand.hbm [shape: f32[2,8,16], index: 7, kind: output, shape index: {}]  }
   0x1   :  { %13 = vsyncpa [#allocation4], 0 }
   0x2   :  { %15 = vsyncpa [#allocation4 + $0x1], 0  ;;  %s2056_s24 = smov 0   ;;  %s2058_s25 = smov 0  }
   0x3   :  { %s2060_s26 = smov 0   ;;  %s2062_s27 = smov 0  }
   0x4   :  { %s2064_s28 = smov 0   ;;  %s2066_s29 = smov 0  }
   0x5 LB: > { %s1424_s30 = sadd.s32 4294967295, %s2004_s29   ;;  %s1425_s8 = sadd.s32 4294967294, %s2004_s29   ;;  %s2004_s29 = sphi %s2066_s29, %s21_s29   ;;  %s2000_s28 = sphi %s2064_s28, %s2440_s28   ;;  %s1996_s27 = sphi %s2062_s27, %s2439_s27   ;;  %s1992_s26 = sphi %s2060_s26, %s2438_s26   ;;  %s1988_s25 = sphi %s2058_s25, %s2437_s25   ;;  %s1984_s24 = sphi %s2056_s24, %s2436_s24  }
   0x6   : > { %s33_s9 = sadd.s32 1, %s2000_s28  ;;  %s194_s10 = sadd.s32 1, %s1992_s26 }
   0x7   : > { %p35_p0 = scmp.ge.s32.totalorder %s33_s9, 2  ;;  %p204_p1 = scmp.ne.s32.totalorder %s1992_s26, %s1988_s25 }
   0x8   : > { %p205_p2 = scmp.eq.s32.totalorder %s1424_s30, 1  ;;  %p210_p3 = scmp.ne.s32.totalorder %s1988_s25, %s1984_s24 }
   0x9   : > { %s2442_s9 = smov (%p35_p0, %s33_s9), 0  ;;  %p211_p5 = scmp.eq.s32.totalorder %s1425_s8, 1 }
   0xa   : > { %p2096_p4 = por %p205_p2, %p204_p1  ;;  %s189_s12 = ssub.s32 %s2000_s28, %s2442_s9 }
   0xb   : > { %p1426_p6 = scmp.ge.s32.totalorder %s2004_s29, 1  ;;  %p192_p7 = scmp.eq.s32.totalorder %s189_s12, 0 }
   0xc   : > { %s2421_s11 = scalar_select %p2096_p4, 1, 0 }
   0xd   : > { %p2103_p8 = por %p211_p5, %p210_p3  ;;  %p218_p9 = scmp.lt.s32.totalorder %s2004_s29, 3 }
   0xe   : > { %s2109_s14 = scalar_select %p192_p7, %s1992_s26, %s194_s10  }
   0xf   : > { %s2422_s13 = scalar_select %p2103_p8, 1, 0 }
  0x10   : > { %p2111_p10 = pnand %p1426_p6, %p218_p9  ;;  %p2115_p11 = scmp.eq.s32.totalorder %s1424_s30, 0 }
  0x11   : > { %s2006_s17 = smov [#allocation2]   ;;  %s1894_s22 = scalar_lea.hbm %s2414_s5, 384 }
  0x12   : > { %s2423_s15 = scalar_select %p2111_p10, 1, 0 }
  0x13   : > { %s2424_s16 = scalar_select %p2115_p11, 1, 0 }
  0x14   : > { %p1764_p12 = pneg %p2111_p10  ;;  %s242_s18 = sshll.u32 %s2006_s17, 4  ;;  %s243_s18 = int_to_ptr.vmem [resolvable:$true] %s242_s18 }
  0x15   : > { %p1895_p0 = scmp.ne.s32.totalorder %s2414_s5, %s1894_s22  ;;  %p1901_p5 = scmp.lt.u32.totalorder %s1894_s22, %s2414_s5 }
  0x16   : > { %p2123_p13 = pnand %p2115_p11, %p1764_p12 }
  0x18   : > { %p1896_p1 = pneg %p2123_p13 }
  0x1a   : > { %p1897_p2 = pnand %p1896_p1, %p1895_p0 }
  0x1c   : > { %p1898_p3 = pneg %p1897_p2 }
  0x1e   : > { %p1903_p6 = pnand %p1901_p5, %p1898_p3 }
  0x20   : > { %1906 = shalt.err (!%p1903_p6)
}
  0x21   : > { %s1907_s12 = scalar_lea.vmem %s243_s18, 384  ;;  %p1915_p8 = scmp.lt.s32.totalorder %s243_s18, %s243_s18 }
  0x22   : > { %p1908_p7 = scmp.ne.s32.totalorder %s243_s18, %s1907_s12  ;;  %p1916_p4 = scmp.lt.s32.totalorder %s1907_s12, %s1907_s12 }
  0x24   : > { %p1910_p9 = pnand %p1908_p7, %p1896_p1  ;;  %p1917_p11 = por %p1916_p4, %p1915_p8 }
  0x26   : > { %p1911_p12 = pneg %p1910_p9 }
  0x28   : > { %p1918_p10 = pnand %p1917_p11, %p1911_p12 }
  0x2a   : > { %1921 = shalt.err (!%p1918_p10)
}
  0x2b   : > { %s2007_s17 = smov 128   ;;  %s2008_s20 = smov 8  }
  0x2c   : > { %1767 = dma.hbm_to_vmem [thread:$0]  (!%p2123_p13), %s2414_s5, 384, %s243_s18, [#allocation3], %s2007_s17, %s2007_s17, %s2008_s20  }
  0x2d   : > { %p2426_p0 = scmp.ne.s32.totalorder %s2423_s15, 0 }
  0x2e   : > { %p2427_p2 = scmp.ne.s32.totalorder (!%p2426_p0), %s2424_s16, 0 }
  0x2f   : > { %269 = sbr.rel (%p2426_p0) target bundleno = 1154 (0x482), region = 48 }
  0x36   : > { %1975 = dma.done.wait (%p2427_p2), [#allocation3], 384  }
  0x37   : > { %1977 = vsyncadd (%p2427_p2), [#allocation3], 4294966912  ;;  %p301_p4 = scmp.lt.s32.totalorder %s1996_s27, 1  ;;  %vm335_vm0 = vcmask 261120   ;;  %v1434_v5 = vld [vmem:[%s2410_s1 + $0x20] sm:$0xff]  ;;  %s2009_s16 = smov 127   ;;  %v676_v41 = vlaneseq }
  0x38   : > { %1561 = vmatprep.mubr.msk.f32.mxu0 %vm335_vm0, %v1434_v5  ;;  %s2010_s12 = smov 126   ;;  %v649_v9 = vld [vmem:[%s2411_s2 + $0x8] sm:$0xff]  ;;  %v648_v10 = vld [vmem:[%s2411_s2] sm:$0xff]  ;;  %v2011_v11 = vmov 0   ;;  %v650_v12 = vld [vmem:[%s2411_s2 + $0x10] sm:$0xff]  ;;  %vm2013_vm9 = vmmov 0  }
  0x39   : > { %s302_s22 = scalar_select %p301_p4, %s1996_s27, 1  ;;  %1853 = vset.pattern.permute.xlu1 %v2011_v11  ;;  %1852 = vset.pattern.permute.xlu0 %v2011_v11  ;;  %v651_v13 = vld [vmem:[%s2411_s2 + $0x18] sm:$0xff]  ;;  %v1435_v23 = vld [vmem:[%s2410_s1 + $0x28] sm:$0xff]  ;;  %v1436_v26 = vld [vmem:[%s2410_s1 + $0x30] sm:$0xff]  ;;  %v2218_v42 = vand.u32 127, %v676_v41  ;;  %vm1327_vm10 = vcmask 130048  }
  0x3a   : > { %v1437_v28 = vld [vmem:[%s2410_s1 + $0x38] sm:$0xff]  ;;  %v310_v32 = vld [vmem:[%s2410_s1] sm:$0xff]  ;;  %v311_v33 = vld [vmem:[%s2410_s1 + $0x8] sm:$0xff]  ;;  %s1486_s15 = sshll.u32 %s1996_s27, 7  ;;  %p2434_p10 = scmp.ne.s32.totalorder %s2421_s11, 0 }
  0x3b   : > { %s1489_s30 = sshll.u32 %s302_s22, 5  ;;  %v312_v35 = vld [vmem:[%s2410_s1 + $0x10] sm:$0xff]  ;;  %v313_v36 = vld [vmem:[%s2410_s1 + $0x18] sm:$0xff]  ;;  %v1446_v37 = vld [vmem:[%s2410_s1 + $0x40] sm:$0xff]  ;;  %v678_v43 = vadd.s32 4294967294, %v2218_v42  ;;  %s2362_s23 = scalar_lea.hbm %s2416_s7, %s1486_s15 }
  0x3c   : > { %s305_s10 = scalar_lea.vmem %s2409_s0, %s1489_s30  ;;  %v1447_v38 = vld [vmem:[%s2410_s1 + $0x48] sm:$0xff]  ;;  %v1448_v39 = vld [vmem:[%s2410_s1 + $0x50] sm:$0xff]  ;;  %v1449_v40 = vld [vmem:[%s2410_s1 + $0x58] sm:$0xff]  ;;  %s2015_s30 = smov [#allocation5]  }
  0x3d   : > { %v306_v0 = vld [vmem:[%s305_s10] sm:$0xff]  ;;  %v307_v1 = vld [vmem:[%s305_s10 + $0x8] sm:$0xff]  ;;  %v308_v2 = vld [vmem:[%s305_s10 + $0x10] sm:$0xff]  ;;  %vm679_vm1 = vcmp.ge.s32.totalorder %v678_v43, 0  ;;  %vm680_vm2 = vcmp.lt.s32.totalorder %v678_v43, 16  ;;  %s1926_s8 = sshll.u32 %s2015_s30, 4  ;;  %s1927_s8 = int_to_ptr.vmem [resolvable:$false] %s1926_s8 }
  0x3e   : > { %v1832_v3 = vpack.i.bf16 %v307_v1, %v306_v0  ;;  %v309_v4 = vld [vmem:[%s305_s10 + $0x18] sm:$0xff]  ;;  %v1678_v6 = vpack.c.bf16 %v307_v1, %v306_v0  ;;  %vm2221_vm3 = vmand %vm679_vm1, %vm680_vm2  ;;  %v1454_v62 = vld [vmem:[%s2412_s3 + $0x20] sm:$0xff]  ;;  %s1928_s19 = scalar_lea.vmem %s1927_s8, 256 }
  0x3f   : > { %v1837_v7 = vpack.i.bf16 %v309_v4, %v308_v2  ;;  %v1682_v8 = vpack.c.bf16 %v309_v4, %v308_v2  ;;  %1603 = vmatprep.mubr.msk.f32.mxu1 %vm335_vm0, %v1454_v62  ;;  %vm2256_vm4 = vmpackc.low %vm2221_vm3, %vm2221_vm3 }
  0x40   : > { %1833 = vrot.lane.b32.xlu0 %v1832_v3, %s2009_s16  ;;  %1843 = vrot.lane.b32.xlu1 %v1832_v3, %s2010_s12 }
  0x44   : > { %1838 = vrot.lane.b32.xlu0 %v1837_v7, %s2009_s16  ;;  %1848 = vrot.lane.b32.xlu1 %v1837_v7, %s2010_s12  ;;  %v1029_v7 = vld [vmem:[%s2413_s4 + $0x10] sm:$0xff] }
  0x48   : > { %659 = vperm.xlu1 %1853, %v649_v9   ;;  %654 = vperm.xlu0 %1852, %v648_v10   ;;  %v1030_v9 = vld [vmem:[%s2413_s4 + $0x18] sm:$0xff] }
  0x4c   : > { %664 = vperm.xlu1 %1853, %v650_v12   ;;  %669 = vperm.xlu0 %1852, %v651_v13  }
  0xb2   : > { %v1834_v14 = vpop.permute.xlu0 %1833  ;;  %v1844_v21 = vpop.permute.xlu1 %1843 }
  0xb3   : > { %v1836_v15 = vunpack.i.h.bf16 %v1834_v14  ;;  %v1835_v16 = vunpack.i.l.bf16 %v1834_v14  ;;  %v1846_v24 = vunpack.i.h.bf16 %v1844_v21  ;;  %v1845_v25 = vunpack.i.l.bf16 %v1844_v21  ;;  %v1456_v21 = vld [vmem:[%s2412_s3 + $0x30] sm:$0xff] }
  0xb5   : > { %v1670_v17 = vpack.c.bf16 %v1836_v15, %v1835_v16  ;;  %v1686_v29 = vpack.c.bf16 %v1846_v24, %v1845_v25  ;;  %v1457_v25 = vld [vmem:[%s2412_s3 + $0x38] sm:$0xff] }
  0xb6   : > { %v1839_v18 = vpop.permute.xlu0 %1838  ;;  %v1849_v27 = vpop.permute.xlu1 %1848 }
  0xb7   : > { %v1841_v19 = vunpack.i.h.bf16 %v1839_v18  ;;  %v1840_v20 = vunpack.i.l.bf16 %v1839_v18  ;;  %1671 = vmatprep.subr.bf16.mxu0 %v1670_v17  ;;  %v1851_v30 = vunpack.i.h.bf16 %v1849_v27  ;;  %v1850_v31 = vunpack.i.l.bf16 %v1849_v27 }
  0xb8   : > { %1673 = vmatpush3.bf16.msra.mxu0 %v1670_v17 }
  0xb9   : > { %v1674_v22 = vpack.c.bf16 %v1841_v19, %v1840_v20  ;;  %v1690_v34 = vpack.c.bf16 %v1851_v30, %v1850_v31  ;;  %v1455_v20 = vld [vmem:[%s2412_s3 + $0x28] sm:$0xff]  ;;  %v692_v31 = vld [vmem:[%s2412_s3 + $0x10] sm:$0xff] }
  0xba   : > { %v691_v30 = vld [vmem:[%s2412_s3 + $0x8] sm:$0xff] }
  0xbb   : > { %1675 = vmatprep.subr.bf16.mxu0 %v1674_v22 }
  0xbc   : > { %1677 = vmatpush3.bf16.msra.mxu0 %v1674_v22 }
  0xbd   : > { %1679 = vmatprep.subr.bf16.mxu0 %v1678_v6 }
  0xbf   : > { %1562 = vmatmul.mubr.msk.f32.vlgmr.msra.gmra.mrb[0].mxu0 %vm335_vm0, %v1435_v23 }
  0xc0   : > { %1681 = vmatpush3.bf16.msra.mxu0 %v1678_v6  ;;  %1564 = vmatprep.mubr.msk.f32.mxu0 %vm335_vm0, %v1436_v26  ;;  %v1027_v6 = vld [vmem:[%s2413_s4] sm:$0xff] }
  0xc1   : > { %1683 = vmatprep.subr.bf16.mxu0 %v1682_v8  ;;  %v690_v26 = vld [vmem:[%s2412_s3] sm:$0xff] }
  0xc3   : > { %1565 = vmatmul.mubr.msk.f32.gmra.mrb[2].mxu0 %vm335_vm0, %v1437_v28 }
  0xc4   : > { %1685 = vmatpush3.bf16.msra.mxu0 %v1682_v8  ;;  %1575 = vmatprep.mubr.msk.f32.mxu0 %vm335_vm0, %v310_v32  ;;  %v1028_v8 = vld [vmem:[%s2413_s4 + $0x8] sm:$0xff] }
  0xc5   : > { %1687 = vmatprep.subr.bf16.mxu0 %v1686_v29 }
  0xc7   : > { %1576 = vmatmul.mubr.msk.f32.vlgmr.msra.gmra.mrb[0].mxu0 %vm335_vm0, %v311_v33  ;;  %v655_v44 = vpop.permute.xlu0 %654  ;;  %v660_v45 = vpop.permute.xlu1 %659  ;;  %v693_v33 = vld [vmem:[%s2412_s3 + $0x18] sm:$0xff] }
  0xc8   : > { %1689 = vmatpush3.bf16.msra.mxu0 %v1686_v29  ;;  %1578 = vmatprep.mubr.msk.f32.mxu0 %vm335_vm0, %v312_v35  ;;  %v1471_v35 = vld [vmem:[%s2412_s3 + $0x48] sm:$0xff] }
  0xc9   : > { %1691 = vmatprep.subr.bf16.mxu0 %v1690_v34 }
  0xcb   : > { %1579 = vmatmul.mubr.msk.f32.gmra.mrb[2].mxu0 %vm335_vm0, %v313_v36  ;;  %v670_v52 = vpop.permute.xlu0 %669  ;;  %v665_v56 = vpop.permute.xlu1 %664  ;;  %v1472_v36 = vld [vmem:[%s2412_s3 + $0x50] sm:$0xff] }
  0xcc   : > { %1693 = vmatpush3.bf16.msra.mxu0 %v1690_v34  ;;  %1589 = vmatprep.mubr.msk.f32.mxu0 %vm335_vm0, %v1446_v37  ;;  %v1470_v34 = vld [vmem:[%s2412_s3 + $0x40] sm:$0xff]  ;;  %v1473_v37 = vld [vmem:[%s2412_s3 + $0x58] sm:$0xff] }
  0xcf   : > { %1590 = vmatmul.mubr.msk.f32.vlgmr.msra.gmra.mrb[0].mxu0 %vm335_vm0, %v1447_v38  ;;  %v2012_v38 = vmov 0.0|0.0  }
  0xd0   : > { %1592 = vmatprep.mubr.msk.f32.mxu0 %vm335_vm0, %v1448_v39  ;;  %1722 = vmatprep.subr.bf16.mxu0 %v2012_v38  ;;  %v1055_v39 = vadd.s32 4294967295, %v2218_v42 }
  0xd2   : > { %vm1056_vm5 = vcmp.ge.s32.totalorder %v1055_v39, 0  ;;  %vm1057_vm6 = vcmp.lt.s32.totalorder %v1055_v39, 16 }
  0xd3   : > { %1593 = vmatmul.mubr.msk.f32.gmra.mrb[2].mxu0 %vm335_vm0, %v1449_v40  ;;  %vm2315_vm7 = vmand %vm1056_vm5, %vm1057_vm6 }
  0xd4   : > { %vm1730_vm8 = vmpackc.low %vm2315_vm7, %vm2315_vm7 }
 0x1a2   : > { %v1591_v46 = vpop.f32.mrb[0].mxu0 }
 0x1a3   : > { %v673_v47 = vadd.f32 %v1591_v46, %v660_v45  ;;  %v625_v48 = vpop.f32.mrb[1].mxu0 }
 0x1a4   : > { %v672_v50 = vadd.f32 %v655_v44, %v625_v48 }
 0x1a5   : > { %v683_v51 = vmax.f32 %v673_v47, 0.0 }
 0x1a6   : > { %v682_v53 = vmax.f32 %v672_v50, 0.0  ;;  %v1594_v54 = vpop.f32.mrb[2].mxu0 }
 0x1a7   : > { %v687_v55 = vsel %vm2221_vm3, %v683_v51, 0.0  ;;  %v675_v57 = vadd.f32 %v1594_v54, %v670_v52  ;;  %v635_v58 = vpop.f32.mrb[3].mxu0 }
 0x1a8   : > { %v686_v59 = vsel %vm2221_vm3, %v682_v53, 0.0  ;;  %v1702_v60 = vpack.c.bf16 %v683_v51, %v682_v53  ;;  %v674_v61 = vadd.f32 %v665_v56, %v635_v58  ;;  %v2014_v58 = vmov 0.0  }
 0x1a9   : > { %v685_v63 = vmax.f32 %v675_v57, 0.0  ;;  %v1854_v0 = vpack.i.bf16 %v687_v55, %v686_v59  ;;  %1645 = vmatprep.mubr.msk.f32.mxu0 %vm2013_vm9, %v2014_v58 }
 0x1aa   : > { %v684_v1 = vmax.f32 %v674_v61, 0.0 }
 0x1ab   : > { %v689_v2 = vsel %vm2221_vm3, %v685_v63, 0.0  ;;  %1855 = vrot.lane.b32.xlu1 %v1854_v0, %s2009_s16 }
 0x1ac   : > { %v688_v3 = vsel %vm2221_vm3, %v684_v1, 0.0  ;;  %v1708_v4 = vpack.c.bf16 %v685_v63, %v684_v1 }
 0x1ad   : > { %v1859_v5 = vpack.i.bf16 %v689_v2, %v688_v3  ;;  %v1067_v2 = vld [vmem:[#allocation2] sm:$0xff] }
 0x1ae   : > { %v1320_v3 = vld [vmem:[%s2415_s6] sm:$0xff] }
 0x1af   : > { %1865 = vrot.lane.b32.xlu1 %v1854_v0, %s2010_s12  ;;  %1860 = vrot.lane.b32.xlu0 %v1859_v5, %s2009_s16 }
 0x1b3   : > { %1033 = vperm.xlu1 %1853, %v1027_v6   ;;  %1870 = vrot.lane.b32.xlu0 %v1859_v5, %s2010_s12 }
 0x1b7   : > { %1043 = vperm.xlu1 %1853, %v1029_v7   ;;  %1038 = vperm.xlu0 %1852, %v1028_v8  }
 0x1bb   : > { %1048 = vperm.xlu0 %1852, %v1030_v9  }
 0x21d   : > { %v1856_v10 = vpop.permute.xlu1 %1855 }
 0x21e   : > { %v1858_v11 = vunpack.i.h.bf16 %v1856_v10  ;;  %v1857_v12 = vunpack.i.l.bf16 %v1856_v10 }
 0x220   : > { %v1694_v13 = vpack.c.bf16 %v1858_v11, %v1857_v12 }
 0x221   : > { %v1861_v14 = vpop.permute.xlu0 %1860  ;;  %v1866_v19 = vpop.permute.xlu1 %1865 }
 0x222   : > { %v1863_v15 = vunpack.i.h.bf16 %v1861_v14  ;;  %v1862_v16 = vunpack.i.l.bf16 %v1861_v14  ;;  %1695 = vmatprep.subr.bf16.mxu1 %v1694_v13  ;;  %v1868_v22 = vunpack.i.h.bf16 %v1866_v19  ;;  %v1867_v23 = vunpack.i.l.bf16 %v1866_v19 }
 0x223   : > { %1697 = vmatpush3.bf16.msra.mxu1 %v1694_v13 }
 0x224   : > { %v1698_v17 = vpack.c.bf16 %v1863_v15, %v1862_v16  ;;  %v1714_v27 = vpack.c.bf16 %v1868_v22, %v1867_v23  ;;  %v1069_v16 = vld [vmem:[#allocation2 + $0x8] sm:$0xff] }
 0x225   : > { %v1871_v24 = vpop.permute.xlu0 %1870 }
 0x226   : > { %1699 = vmatprep.subr.bf16.mxu1 %v1698_v17  ;;  %v1873_v28 = vunpack.i.h.bf16 %v1871_v24  ;;  %v1872_v29 = vunpack.i.l.bf16 %v1871_v24 }
 0x227   : > { %1701 = vmatpush3.bf16.msra.mxu1 %v1698_v17 }
 0x228   : > { %1704 = vmatprep.subr.msk.bf16.mxu1 %vm2256_vm4, %v1702_v60  ;;  %v1718_v32 = vpack.c.bf16 %v1873_v28, %v1872_v29 }
 0x22a   : > { %1604 = vmatmul.mubr.msk.f32.vlgmr.msra.gmra.mrb[0].mxu1 %vm335_vm0, %v1455_v20 }
 0x22b   : > { %1707 = vmatpush3.bf16.msk.msra.mxu1 %vm2256_vm4, %v1702_v60  ;;  %1606 = vmatprep.mubr.msk.f32.mxu1 %vm335_vm0, %v1456_v21  ;;  %v1233_v21 = vld [vmem:[#allocation2 + $0x10] sm:$0xff] }
 0x22c   : > { %1710 = vmatprep.subr.msk.bf16.mxu1 %vm2256_vm4, %v1708_v4 }
 0x22e   : > { %1607 = vmatmul.mubr.msk.f32.gmra.mrb[2].mxu1 %vm335_vm0, %v1457_v25 }
 0x22f   : > { %1713 = vmatpush3.bf16.msk.msra.mxu1 %vm2256_vm4, %v1708_v4  ;;  %1617 = vmatprep.mubr.msk.f32.mxu1 %vm335_vm0, %v690_v26 }
 0x230   : > { %1715 = vmatprep.subr.bf16.mxu1 %v1714_v27 }
 0x232   : > { %1618 = vmatmul.mubr.msk.f32.vlgmr.msra.gmra.mrb[0].mxu1 %vm335_vm0, %v691_v30  ;;  %v1034_v41 = vpop.permute.xlu1 %1033 }
 0x233   : > { %1717 = vmatpush3.bf16.msra.mxu1 %v1714_v27  ;;  %1620 = vmatprep.mubr.msk.f32.mxu1 %vm335_vm0, %v692_v31 }
 0x234   : > { %1719 = vmatprep.subr.bf16.mxu1 %v1718_v32 }
 0x236   : > { %1621 = vmatmul.mubr.msk.f32.gmra.mrb[2].mxu1 %vm335_vm0, %v693_v33  ;;  %v1039_v40 = vpop.permute.xlu0 %1038  ;;  %v1044_v52 = vpop.permute.xlu1 %1043 }
 0x237   : > { %1721 = vmatpush3.bf16.msra.mxu1 %v1718_v32  ;;  %1631 = vmatprep.mubr.msk.f32.mxu1 %vm335_vm0, %v1470_v34 }
 0x238   : > { %1728 = vmatprep.subr.bf16.mxu1 %v2012_v38 }
 0x23a   : > { %1632 = vmatmul.mubr.msk.f32.vlgmr.msra.gmra.mrb[0].mxu1 %vm335_vm0, %v1471_v35  ;;  %v1049_v49 = vpop.permute.xlu0 %1048 }
 0x23b   : > { %1634 = vmatprep.mubr.msk.f32.mxu1 %vm335_vm0, %v1472_v36 }
 0x23e   : > { %1635 = vmatmul.mubr.msk.f32.gmra.mrb[2].mxu1 %vm335_vm0, %v1473_v37 }
 0x23f   : > { %1656 = vmatprep.mubr.msk.f32.mxu1 %vm2013_vm9, %v2014_v58 }
 0x30d   : > { %v1633_v43 = vpop.f32.mrb[0].mxu1 }
 0x30e   : > { %v1052_v44 = vadd.f32 %v1633_v43, %v1039_v40  ;;  %v1004_v45 = vpop.f32.mrb[1].mxu1 }
 0x30f   : > { %v1051_v47 = vadd.f32 %v1034_v41, %v1004_v45 }
 0x310   : > { %v1060_v48 = vmax.f32 %v1052_v44, 0.0 }
 0x311   : > { %v1059_v50 = vmax.f32 %v1051_v47, 0.0  ;;  %v1636_v51 = vpop.f32.mrb[2].mxu1 }
 0x312   : > { %v1064_v42 = vsel %vm2315_vm7, %v1060_v48, 0.0  ;;  %v1054_v53 = vadd.f32 %v1636_v51, %v1049_v49  ;;  %v1014_v54 = vpop.f32.mrb[3].mxu1 }
 0x313   : > { %v1063_v55 = vsel %vm2315_vm7, %v1059_v50, 0.0  ;;  %v1729_v56 = vpack.c.bf16 %v1060_v48, %v1059_v50  ;;  %v1053_v57 = vadd.f32 %v1044_v52, %v1014_v54 }
 0x314   : > { %v1062_v59 = vmax.f32 %v1054_v53, 0.0  ;;  %v1874_v60 = vpack.i.bf16 %v1064_v42, %v1063_v55 }
 0x315   : > { %v1061_v61 = vmax.f32 %v1053_v57, 0.0  ;;  %1731 = vmatpush3.bf16.msk.msra.mxu1 %vm1730_vm8, %v1729_v56 }
 0x316   : > { %v1066_v62 = vsel %vm2315_vm7, %v1062_v59, 0.0  ;;  %1875 = vrot.lane.b32.xlu1 %v1874_v60, %s2009_s16  ;;  %1732 = vmatprep.subr.bf16.mxu1 %v2012_v38 }
 0x317   : > { %v1065_v63 = vsel %vm2315_vm7, %v1061_v61, 0.0  ;;  %v1733_v0 = vpack.c.bf16 %v1062_v59, %v1061_v61 }
 0x318   : > { %v1879_v1 = vpack.i.bf16 %v1066_v62, %v1065_v63 }
 0x319   : > { %1735 = vmatpush3.bf16.msk.msra.mxu1 %vm1730_vm8, %v1733_v0 }
 0x31a   : > { %1885 = vrot.lane.b32.xlu1 %v1874_v60, %s2010_s12  ;;  %1880 = vrot.lane.b32.xlu0 %v1879_v1, %s2009_s16  ;;  %s298_s16 = sand.u32 1, %s1988_s25  }
 0x31b   : > { %s1330_s22 = scalar_lea.sflag [#allocation4], %s298_s16 }
 0x31c   : > { %1657 = vmatmul.mubr.msk.f32.vlgmr.msra.gmra.mrb[4].mxu1 %vm335_vm0, %v1067_v2 }
 0x31e   : > { %1323 = vperm.xlu1 %1853, %v1320_v3   ;;  %1890 = vrot.lane.b32.xlu0 %v1879_v1, %s2010_s12  ;;  %s1431_s12 = sshll.u32 %s298_s16, 3 }
 0x31f   : > { %s300_s18 = scalar_lea.vmem [#allocation5], %s1431_s12 }
 0x320   : > { %s1344_s17 = sshll.u32 %s300_s18, 4  ;;  %s2364_s17 = int_to_ptr.vmem [resolvable:$true] %s1344_s17 }
 0x321   : > { %s1922_s27 = scalar_lea.vmem %s2364_s17, 128  ;;  %p1929_p1 = scmp.lt.s32.totalorder %s2364_s17, %s1927_s8 }
 0x322   : > { %p1923_p8 = scmp.ne.s32.totalorder %s2364_s17, %s1922_s27  ;;  %p1930_p3 = scmp.lt.s32.totalorder %s1928_s19, %s1922_s27 }
 0x324   : > { %p1924_p11 = pnand %p1923_p8, %p2434_p10  ;;  %p1931_p5 = por %p1930_p3, %p1929_p1 }
 0x326   : > { %p1925_p13 = pneg %p1924_p11 }
 0x328   : > { %p1932_p6 = pnand %p1931_p5, %p1925_p13 }
 0x388   : > { %v1876_v4 = vpop.permute.xlu1 %1875 }
 0x389   : > { %v1878_v5 = vunpack.i.h.bf16 %v1876_v4  ;;  %v1877_v6 = vunpack.i.l.bf16 %v1876_v4 }
 0x38b   : > { %v1723_v7 = vpack.c.bf16 %v1878_v5, %v1877_v6 }
 0x38c   : > { %v1886_v8 = vpop.permute.xlu1 %1885  ;;  %v1881_v9 = vpop.permute.xlu0 %1880 }
 0x38d   : > { %v1883_v10 = vunpack.i.h.bf16 %v1881_v9  ;;  %v1882_v11 = vunpack.i.l.bf16 %v1881_v9  ;;  %1724 = vmatpush3.bf16.msra.mxu0 %v1723_v7  ;;  %v1888_v12 = vunpack.i.h.bf16 %v1886_v8  ;;  %v1887_v13 = vunpack.i.l.bf16 %v1886_v8 }
 0x38e   : > { %1725 = vmatprep.subr.bf16.mxu0 %v2012_v38 }
 0x38f   : > { %v1726_v14 = vpack.c.bf16 %v1883_v10, %v1882_v11  ;;  %v1737_v17 = vpack.c.bf16 %v1888_v12, %v1887_v13 }
 0x390   : > { %v1891_v15 = vpop.permute.xlu0 %1890 }
 0x391   : > { %1727 = vmatpush3.bf16.msra.mxu0 %v1726_v14  ;;  %v1893_v18 = vunpack.i.h.bf16 %v1891_v15  ;;  %v1892_v19 = vunpack.i.l.bf16 %v1891_v15 }
 0x392   : > { %1736 = vmatprep.subr.bf16.mxu0 %v2012_v38 }
 0x393   : > { %v1740_v20 = vpack.c.bf16 %v1893_v18, %v1892_v19 }
 0x394   : > { %1646 = vmatmul.mubr.msk.f32.vlgmr.msra.gmra.mrb[4].mxu0 %vm335_vm0, %v1069_v16 }
 0x395   : > { %1738 = vmatpush3.bf16.msra.mxu0 %v1737_v17  ;;  %1667 = vmatprep.mubr.msk.f32.mxu0 %vm2013_vm9, %v2014_v58 }
 0x396   : > { %1739 = vmatprep.subr.bf16.mxu0 %v2012_v38 }
 0x399   : > { %1741 = vmatpush3.bf16.msra.mxu0 %v1740_v20 }
 0x39c   : > { %1668 = vmatmul.mubr.msk.f32.vlgmr.msra.gmra.mrb[6].mxu0 %vm335_vm0, %v1233_v21 }
 0x39d   : > { %v1324_v30 = vpop.permute.xlu1 %1323 }
 0x3ef   : > { %v1228_v22 = vpop.f32.mrb[4].mxu1 }
 0x3f0   : > { %v1658_v23 = vpop.f32.mrb[5].mxu1 }
 0x467   : > { %v1155_v24 = vpop.f32.mrb[4].mxu0 }
 0x468   : > { %v1647_v25 = vpop.f32.mrb[5].mxu0  ;;  %v1229_v26 = vadd.f32 %v1228_v22, %v1155_v24 }
 0x46f   : > { %v1315_v27 = vpop.f32.mrb[6].mxu0 }
 0x470   : > { %v1319_v28 = vadd.f32 %v1315_v27, %v1229_v26  ;;  %v1669_v29 = vpop.f32.mrb[7].mxu0 }
 0x472   : > { %v1326_v31 = vadd.f32 %v1324_v30, %v1319_v28 }
 0x474   : > { %1328 = vst.msk [vmem:[%s300_s18] sm:$0xff] %vm1327_vm10, %v1326_v31 }
 0x475   : > { %1935 = shalt.err (!%p1932_p6)
}
 0x476   : > { %s1936_s10 = scalar_lea.hbm %s2362_s23, 128  ;;  %s1940_s15 = scalar_lea.hbm %s2416_s7, 256 }
 0x477   : > { %p1937_p7 = scmp.ne.s32.totalorder %s2362_s23, %s1936_s10  ;;  %p1941_p0 = scmp.lt.u32.totalorder %s2362_s23, %s2416_s7 }
 0x478   : > { %p1942_p2 = scmp.lt.u32.totalorder %s1940_s15, %s1936_s10  ;;  %p1944_p8 = scmp.lt.u32.totalorder %s1936_s10, %s2362_s23 }
 0x479   : > { %p1938_p9 = pnand %p1937_p7, %p2434_p10 }
 0x47a   : > { %p1943_p4 = por %p1942_p2, %p1941_p0 }
 0x47b   : > { %p1939_p12 = pneg %p1938_p9 }
 0x47c   : > { %p1945_p11 = por %p1944_p8, %p1943_p4 }
 0x47e   : > { %p1946_p13 = pnand %p1945_p11, %p1939_p12 }
 0x480   : > { %1949 = shalt.err (!%p1946_p13)
}
 0x481   : > { %1762 = dma.vmem_to_hbm [thread:$0]  (%p2434_p10), %s2364_s17, 128, %s2362_s23, %s1330_s22  }
 0x482 PF: > { %p1774_p1 = scmp.ge.s32.totalorder %s2004_s29, 2  ;;  %s1356_s21 = sand.u32 1, %s1984_s24  }
 0x483   : > { %p2435_p3 = scmp.ne.s32.totalorder %s2422_s13, 0  ;;  %s1357_s27 = scalar_lea.sflag [#allocation4], %s1356_s21 }
 0x485   : > { %p1769_p5 = pnand %p1774_p1, %p2435_p3 }
 0x487   : > { %1979 = dma.done.wait (!%p1769_p5), %s1357_s27, 128  }
 0x488   : > { %1981 = vsyncadd (!%p1769_p5), %s1357_s27, 4294967168  ;;  %s21_s29 = sadd.s32 1, %s2004_s29   ;;  %s2436_s24 = smov %s1988_s25 }
 0x489   : > { %p18_p6 = scmp.ge.s32.totalorder %s21_s29, 4   ;;  %s2437_s25 = smov %s1992_s26 }
 0x48a   : > { %s2438_s26 = smov %s2109_s14  ;;  %s2439_s27 = smov %s2000_s28 }
 0x48b   : > { %s2440_s28 = smov %s2442_s9  ;;  %20 = sbr.rel (!%p18_p6) target bundleno = 5 (0x5), region = 94 }
 0x492   :  { %1362 = vsyncpa [#allocation3], 1 }
 0x493   :  { %1364 = vsyncpa [#allocation3 + $0x1], 1 }
 0x494   :  { %1365 = vsyncpa [#allocation4], 1 }
 0x495   :  { %1367 = vsyncpa [#allocation4 + $0x1], 1 }

</bundles_post_ra>
